<compile_context>
chip_gen: v7x
topology: tpu7x:2x2x1
jax: 0.10.0
libtpu: 0.0.40
codegen_flags: <defaults>
</compile_context>

<pallas_src>
import jax
import jax.numpy as jnp
from jax.experimental import pallas as pl
from jax.experimental.pallas import tpu as pltpu


def _pick_batch_tile(B, L):
    """Fatten grid steps (target ~256 matmul rows per step) but keep >=2
    parallel grid steps when possible so both v7x TensorCores get work."""
    bt = max(1, min(B, 256 // max(L, 1)))
    if B >= 2:
        bt = min(bt, B // 2)
    bt = max(bt, 1)
    while B % bt:           # must divide B evenly
        bt -= 1
    return bt


def _make_kernel(n_taps, pad_l, pad_r, L, Cin, Ctot, bt, compute_dtype):
    """Build the Pallas kernel body (closed over static config)."""

    def kernel(x_ref, w_ref, b_ref, o_ref, xpad_ref):
        # x_ref:   (bt, L, Cin)        activations for this batch tile
        # w_ref:   (n_taps*Cin, Ctot)  fused conv weights (all taps/filters)
        # b_ref:   (1, Ctot)           fused bias (float32)
        # o_ref:   (bt, L, Ctot)       output tile
        # xpad_ref: VMEM scratch (bt, L + pad_l + pad_r, Cin)

        # 'same' padding done in VMEM: zero the halo rows, copy the interior.
        if pad_l:
            xpad_ref[:, :pad_l, :] = jnp.zeros((bt, pad_l, Cin), compute_dtype)
        if pad_r:
            xpad_ref[:, pad_l + L:, :] = jnp.zeros((bt, pad_r, Cin),
                                                   compute_dtype)
        xpad_ref[:, pad_l:pad_l + L, :] = x_ref[...]

        # im2col: one (bt*L, n_taps*Cin) slab from shifted slices.
        rows = []
        for i in range(bt):
            xp = xpad_ref[i]                                   # (Lp, Cin)
            taps = [xp[t:t + L, :] for t in range(n_taps)]     # n_taps slices
            rows.append(jnp.concatenate(taps, axis=1))         # (L, n_taps*Cin)
        lhs = rows[0] if bt == 1 else jnp.concatenate(rows, axis=0)

        # Bias-initialized f32 accumulator + a single MXU matmul.
        acc = jnp.broadcast_to(b_ref[...].astype(jnp.float32), (bt * L, Ctot))
        acc = acc + jnp.dot(lhs, w_ref[...],
                            preferred_element_type=jnp.float32)

        # One unsliced, lane-dense store per batch element (no channel slicing).
        for i in range(bt):
            o_ref[i] = acc[i * L:(i + 1) * L, :].astype(o_ref.dtype)

    return kernel


def conv1d_block_forward(x, weights, biases, kernel_sizes, *,
                         batch_tile=None, compute_dtype=jnp.float32):
    """x: (B, L, Cin).  weights[i]: (Cout, Cin, k_i) in PyTorch Conv1d layout.
    Returns (B, L, Cout * n_filters).  stride=1 / padding='same' semantics."""
    B, L, Cin = x.shape
    Cout = weights[0].shape[0]
    n_filters = len(kernel_sizes)
    Ctot = Cout * n_filters

    # PyTorch 'same' padding (stride 1): left=(k-1)//2, right=k//2 per filter.
    lefts = [(k - 1) // 2 for k in kernel_sizes]
    rights = [k // 2 for k in kernel_sizes]
    pad_l, pad_r = max(lefts), max(rights)
    n_taps = pad_l + pad_r + 1
    Lp = L + pad_l + pad_r

    # Fuse all taps of all filters into one (n_taps*Cin, Ctot) matrix so the
    # kernel does a single matmul per tile.  Filter i occupies tap rows
    # [off_i, off_i + k_i) with off_i aligning its own 'same' padding to the
    # shared pad_l halo; everything else is zero.
    wcat = jnp.zeros((n_taps * Cin, Ctot), compute_dtype)
    for i, (w, k) in enumerate(zip(weights, kernel_sizes)):
        off = pad_l - lefts[i]
        wt = jnp.transpose(w, (2, 1, 0)).reshape(k * Cin, Cout)  # (k*Cin, Cout)
        wcat = wcat.at[off * Cin:(off + k) * Cin,
                       i * Cout:(i + 1) * Cout].set(wt.astype(compute_dtype))
    bcat = jnp.concatenate(
        [b.reshape(1, Cout) for b in biases], axis=1).astype(jnp.float32)

    bt = batch_tile if batch_tile is not None else _pick_batch_tile(B, L)
    assert B % bt == 0, (B, bt)
    nb = B // bt

    xin = x.astype(compute_dtype)

    kernel = _make_kernel(n_taps, pad_l, pad_r, L, Cin, Ctot, bt,
                          compute_dtype)

    # Advisory cost estimate so XLA schedules the custom call sensibly.
    itemsize = jnp.dtype(compute_dtype).itemsize
    flops = 2 * B * L * n_taps * Cin * Ctot
    bytes_accessed = (B * L * Cin * itemsize              # activations in
                      + n_taps * Cin * Ctot * itemsize    # fused weights
                      + Ctot * 4                          # fused bias
                      + B * L * Ctot * x.dtype.itemsize)  # output

    out = pl.pallas_call(
        kernel,
        out_shape=jax.ShapeDtypeStruct((B, L, Ctot), x.dtype),
        grid=(nb,),
        in_specs=[
            pl.BlockSpec((bt, L, Cin), lambda b: (b, 0, 0)),
            pl.BlockSpec((n_taps * Cin, Ctot), lambda b: (0, 0)),
            pl.BlockSpec((1, Ctot), lambda b: (0, 0)),
        ],
        out_specs=pl.BlockSpec((bt, L, Ctot), lambda b: (b, 0, 0)),
        scratch_shapes=[pltpu.VMEM((bt, Lp, Cin), compute_dtype)],
        compiler_params=pltpu.CompilerParams(
            dimension_semantics=("parallel",)),
        cost_estimate=pl.CostEstimate(flops=flops, transcendentals=0,
                                      bytes_accessed=bytes_accessed),
    )(xin, wcat, bcat)
    return out


def _reference(x, weights, biases, kernel_sizes):
    """Pure-JAX reference mirroring the PyTorch forward exactly."""
    x_ncl = jnp.transpose(x, (0, 2, 1))  # (B, Cin, L)
    outs = []
    for w, b, k in zip(weights, biases, kernel_sizes):
        y = jax.lax.conv_general_dilated(
            x_ncl, w, window_strides=(1,),
            padding=[((k - 1) // 2, k // 2)],          # PyTorch 'same'
            dimension_numbers=("NCH", "OIH", "NCH"))
        y = y + b[None, :, None]
        outs.append(y)
    y = jnp.concatenate(outs, axis=-2)                 # concat over channels
    return jnp.transpose(y, (0, 2, 1))                 # back to (B, L, Ctot)


if __name__ == "__main__":
    B, L = 2, 16
    Cin, Cout = 32, 64            # Ctot = 2 * 64 = 128 -> lane-dense stores
    kernel_sizes = [3, 5]

    key = jax.random.PRNGKey(0)
    kx, *kws = jax.random.split(key, 1 + 2 * len(kernel_sizes))

    x = jax.random.normal(kx, (B, L, Cin), dtype=jnp.float32)

    weights, biases = [], []
    for i, k in enumerate(kernel_sizes):
        # PyTorch Conv1d weight layout: (out_channels, in_channels, k)
        w = 0.1 * jax.random.normal(kws[2 * i], (Cout, Cin, k),
                                    dtype=jnp.float32)
        b = 0.1 * jax.random.normal(kws[2 * i + 1], (Cout,),
                                    dtype=jnp.float32)
        weights.append(w)
        biases.append(b)

    out = conv1d_block_forward(x, weights, biases, kernel_sizes)
    out = jax.block_until_ready(out)

    ref = _reference(x, weights, biases, kernel_sizes)
    assert out.shape == (B, L, Cout * len(kernel_sizes)), out.shape
    max_err = float(jnp.max(jnp.abs(out - ref)))
    assert jnp.allclose(out, ref, atol=1e-4, rtol=1e-4), max_err

    print("KERNEL_OK")
</pallas_src>

<mosaic_0001>
module attributes {stable_mosaic.version = 11 : i64} {
  func.func @kernel(%arg0: i32, %arg1: memref<1x16x32xf32, #tpu.memory_space<vmem>>, %arg2: memref<160x128xf32, #tpu.memory_space<vmem>>, %arg3: memref<1x128xf32, #tpu.memory_space<vmem>>, %arg4: memref<1x16x128xf32, #tpu.memory_space<vmem>>, %arg5: memref<1x20x32xf32, #tpu.memory_space<vmem>>) attributes {dimension_semantics = [#tpu.dimension_semantics<parallel>], iteration_bounds = array<i64: 2>, scalar_prefetch = 0 : i64, scratch_operands = 1 : i64, tpu.core_type = #tpu.core_type<tc>, window_params = [{transform_indices = @transform_0, window_bounds = array<i64: 1, 16, 32>}, {pipeline_mode = #tpu.pipeline_mode<synchronous>, transform_indices = @transform_1, window_bounds = array<i64: 160, 128>}, {pipeline_mode = #tpu.pipeline_mode<synchronous>, transform_indices = @transform_2, window_bounds = array<i64: 1, 128>}, {transform_indices = @transform_3, window_bounds = array<i64: 1, 16, 128>}]} {
    %cst = arith.constant 0.000000e+00 : f32
    %0 = vector.broadcast %cst : f32 to vector<1x2x32xf32>
    %c0 = arith.constant 0 : index
    %c0_0 = arith.constant 0 : index
    %c0_1 = arith.constant 0 : index
    %1 = vector.load %arg5[%c0, %c0_0, %c0_1] : memref<1x20x32xf32, #tpu.memory_space<vmem>>, vector<1x2x32xf32>
    tpu.vector_store %arg5[%c0, %c0_0, %c0_1], %0 {strides = array<i32>} : memref<1x20x32xf32, #tpu.memory_space<vmem>>, vector<1x2x32xf32>,
    %cst_2 = arith.constant 0.000000e+00 : f32
    %2 = vector.broadcast %cst_2 : f32 to vector<1x2x32xf32>
    %c0_3 = arith.constant 0 : index
    %c18 = arith.constant 18 : index
    %c0_4 = arith.constant 0 : index
    %3 = vector.load %arg5[%c0_3, %c18, %c0_4] : memref<1x20x32xf32, #tpu.memory_space<vmem>>, vector<1x2x32xf32>
    tpu.vector_store %arg5[%c0_3, %c18, %c0_4], %2 {strides = array<i32>} : memref<1x20x32xf32, #tpu.memory_space<vmem>>, vector<1x2x32xf32>,
    %c0_5 = arith.constant 0 : index
    %c0_6 = arith.constant 0 : index
    %c0_7 = arith.constant 0 : index
    %4 = vector.load %arg1[%c0_5, %c0_6, %c0_7] : memref<1x16x32xf32, #tpu.memory_space<vmem>>, vector<1x16x32xf32>
    %c0_8 = arith.constant 0 : index
    %c2 = arith.constant 2 : index
    %c0_9 = arith.constant 0 : index
    %5 = vector.load %arg5[%c0_8, %c2, %c0_9] : memref<1x20x32xf32, #tpu.memory_space<vmem>>, vector<1x16x32xf32>
    tpu.vector_store %arg5[%c0_8, %c2, %c0_9], %4 {strides = array<i32>} : memref<1x20x32xf32, #tpu.memory_space<vmem>>, vector<1x16x32xf32>,
    %c0_10 = arith.constant 0 : index
    %c0_11 = arith.constant 0 : index
    %c0_12 = arith.constant 0 : index
    %6 = vector.load %arg5[%c0_10, %c0_11, %c0_12] : memref<1x20x32xf32, #tpu.memory_space<vmem>>, vector<1x20x32xf32>
    %7 = vector.shape_cast %6 : vector<1x20x32xf32> to vector<20x32xf32>
    %8 = vector.extract_strided_slice %7 {offsets = [0, 0], sizes = [16, 32], strides = [1, 1]} : vector<20x32xf32> to vector<16x32xf32>
    %9 = vector.extract_strided_slice %7 {offsets = [1, 0], sizes = [16, 32], strides = [1, 1]} : vector<20x32xf32> to vector<16x32xf32>
    %10 = vector.extract_strided_slice %7 {offsets = [2, 0], sizes = [16, 32], strides = [1, 1]} : vector<20x32xf32> to vector<16x32xf32>
    %11 = vector.extract_strided_slice %7 {offsets = [3, 0], sizes = [16, 32], strides = [1, 1]} : vector<20x32xf32> to vector<16x32xf32>
    %12 = vector.extract_strided_slice %7 {offsets = [4, 0], sizes = [16, 32], strides = [1, 1]} : vector<20x32xf32> to vector<16x32xf32>
    %13 = tpu.concatenate %8, %9, %10, %11, %12 in 1 : vector<16x32xf32>, vector<16x32xf32>, vector<16x32xf32>, vector<16x32xf32>, vector<16x32xf32> -> vector<16x160xf32>
    %c0_13 = arith.constant 0 : index
    %c0_14 = arith.constant 0 : index
    %14 = vector.load %arg3[%c0_13, %c0_14] : memref<1x128xf32, #tpu.memory_space<vmem>>, vector<1x128xf32>
    %15 = vector.shape_cast %14 : vector<1x128xf32> to vector<1x128xf32>
    %16 = vector.broadcast %15 : vector<1x128xf32> to vector<16x128xf32>
    %c0_15 = arith.constant 0 : index
    %c0_16 = arith.constant 0 : index
    %17 = vector.load %arg2[%c0_15, %c0_16] : memref<160x128xf32, #tpu.memory_space<vmem>>, vector<160x128xf32>
    %cst_17 = arith.constant dense<0.000000e+00> : vector<16x128xf32>
    %18 = tpu.matmul %13, %17, %cst_17 {dimension_numbers = #tpu.dot_dimension_numbers<[1], [0], [0], [1], [0, 0, 1, 1], [], []>} : vector<16x160xf32>, vector<160x128xf32>, vector<16x128xf32> -> vector<16x128xf32>
    %19 = arith.addf %16, %18 : vector<16x128xf32>
    %c0_18 = arith.constant 0 : index
    %c0_19 = arith.constant 0 : index
    %c0_20 = arith.constant 0 : index
    %20 = vector.load %arg4[%c0_18, %c0_19, %c0_20] : memref<1x16x128xf32, #tpu.memory_space<vmem>>, vector<1x16x128xf32>
    %21 = vector.shape_cast %20 : vector<1x16x128xf32> to vector<16x128xf32>
    %22 = vector.shape_cast %19 : vector<16x128xf32> to vector<1x16x128xf32>
    tpu.vector_store %arg4[%c0_18, %c0_19, %c0_20], %22 {strides = array<i32>} : memref<1x16x128xf32, #tpu.memory_space<vmem>>, vector<1x16x128xf32>,
    return
  }
  func.func @transform_0(%arg0: i32) -> (i32, i32, i32) {
    %c0_i32 = arith.constant 0 : i32
    %c0_i32_0 = arith.constant 0 : i32
    %c0_i32_1 = arith.constant 0 : i32
    return %arg0, %c0_i32, %c0_i32_0 : i32, i32, i32
  }
  func.func @transform_1(%arg0: i32) -> (i32, i32) {
    %c0_i32 = arith.constant 0 : i32
    %c0_i32_0 = arith.constant 0 : i32
    %c0_i32_1 = arith.constant 0 : i32
    return %c0_i32, %c0_i32_0 : i32, i32
  }
  func.func @transform_2(%arg0: i32) -> (i32, i32) {
    %c0_i32 = arith.constant 0 : i32
    %c0_i32_0 = arith.constant 0 : i32
    %c0_i32_1 = arith.constant 0 : i32
    return %c0_i32, %c0_i32_0 : i32, i32
  }
  func.func @transform_3(%arg0: i32) -> (i32, i32, i32) {
    %c0_i32 = arith.constant 0 : i32
    %c0_i32_0 = arith.constant 0 : i32
    %c0_i32_1 = arith.constant 0 : i32
    return %arg0, %c0_i32, %c0_i32_0 : i32, i32, i32
  }
}

</mosaic_0001>

<bundles_post_ra>
// kernel: tpu_custom_call.1
= control target key start
LH: loop header
LB: loop body
LE: loop exit
PB: predicated region body
PF: predicated region fallthrough
CT: control target
= control target key end

     0   :  { %8 = vsyncpa [#allocation4], 0  ;;  %s1049_s0 = inlined_call_operand.hbm [shape: f32[2,16,32], index: 0, kind: input, shape index: {}]   ;;  %s1050_s1 = inlined_call_operand.hbm [shape: f32[160,128], index: 1, kind: input, shape index: {}]   ;;  %s1051_s2 = inlined_call_operand.vmem [shape: f32[1,128], index: 2, kind: input, shape index: {}]   ;;  %s1052_s3 = inlined_call_operand.hbm [shape: f32[2,16,128], index: 3, kind: output, shape index: {}]  }
   0x1   :  { %10 = vsyncpa [#allocation4 + $0x1], 0 }
   0x2   :  { %11 = vsyncpa [#allocation7], 0 }
   0x3   :  { %12 = vsyncpa [#allocation5], 0 }
   0x4   :  { %14 = vsyncpa [#allocation5 + $0x1], 0  ;;  %s789_s12 = smov 0   ;;  %s791_s13 = smov 0  }
   0x5   :  { %s793_s14 = smov 0   ;;  %s795_s15 = smov 0  }
   0x6 LB: > { %s810_s16 = sadd.s32 4294967295, %s755_s15   ;;  %s475_s17 = sadd.s32 4294967294, %s755_s15   ;;  %s755_s15 = sphi %s795_s15, %s1072_s15   ;;  %s751_s14 = sphi %s793_s14, %s1071_s14   ;;  %s747_s13 = sphi %s791_s13, %s1070_s13   ;;  %s743_s12 = sphi %s789_s12, %s1069_s12  }
   0x7   : > { %p40_p0 = scmp.ne.s32.totalorder %s747_s13, %s743_s12  ;;  %p1053_p1 = scmp.eq.s32.totalorder %s810_s16, 0 }
   0x8   : > { %p112_p3 = scmp.eq.s32.totalorder %s475_s17, 1  ;;  %p476_p5 = scmp.ge.s32.totalorder %s755_s15, 1 }
   0x9   : > { %p819_p4 = por %p1053_p1, %p40_p0  ;;  %p119_p7 = scmp.lt.s32.totalorder %s755_s15, 3 }
   0xa   : > { %p824_p6 = por %p112_p3, %p40_p0  ;;  %s757_s21 = smov [#allocation6]  }
   0xb   : > { %s1056_s18 = scalar_select %p819_p4, 1, 0 }
   0xc   : > { %s1057_s19 = scalar_select %p824_p6, 1, 0 }
   0xd   : > { %p829_p8 = pnand %p476_p5, %p119_p7  ;;  %s131_s22 = sshll.u32 %s757_s21, 4  ;;  %s833_s22 = int_to_ptr.vmem [resolvable:$true] %s131_s22 }
   0xe   : > { %s845_s24 = sadd.s32 1, %s755_s15   ;;  %s27_s25 = sadd.s32 1, %s751_s14 }
   0xf   : > { %s1058_s20 = scalar_select %p829_p8, 1, 0 }
  0x10   : > { %p554_p9 = pneg %p829_p8  ;;  %s24_s26 = ssub.s32 %s755_s15, %s845_s24 }
  0x11   : > { %s627_s29 = scalar_lea.hbm %s1050_s1, 2560 }
  0x12   : > { %p840_p11 = pnand %p554_p9, %p1053_p1  ;;  %p628_p12 = scmp.ne.s32.totalorder %s1050_s1, %s627_s29 }
  0x13   : > { %p634_p5 = scmp.lt.u32.totalorder %s627_s29, %s1050_s1 }
  0x14   : > { %p629_p13 = pneg %p840_p11 }
  0x16   : > { %p630_p0 = pnand %p629_p13, %p628_p12 }
  0x18   : > { %p631_p3 = pneg %p630_p0 }
  0x1a   : > { %p636_p7 = pnand %p634_p5, %p631_p3 }
  0x1c   : > { %639 = shalt.err (!%p636_p7)
}
  0x1d   : > { %s640_s7 = scalar_lea.vmem %s833_s22, 2560  ;;  %p648_p2 = scmp.lt.s32.totalorder %s833_s22, %s833_s22 }
  0x1e   : > { %p641_p9 = scmp.ne.s32.totalorder %s833_s22, %s640_s7  ;;  %p649_p6 = scmp.lt.s32.totalorder %s640_s7, %s640_s7 }
  0x20   : > { %p643_p10 = pnand %p641_p9, %p629_p13  ;;  %p650_p4 = por %p649_p6, %p648_p2 }
  0x22   : > { %p644_p1 = pneg %p643_p10 }
  0x24   : > { %p651_p8 = pnand %p650_p4, %p644_p1 }
  0x26   : > { %654 = shalt.err (!%p651_p8)
}
  0x27   : > { %s758_s8 = smov 128   ;;  %s759_s9 = smov 8  }
  0x28   : > { %557 = dma.hbm_to_vmem [thread:$0]  (!%p840_p11), %s1050_s1, 2560, %s833_s22, [#allocation7], %s758_s8, %s758_s8, %s759_s9  }
  0x29   : > { %p25_p1 = scmp.eq.s32.totalorder %s24_s26, 0  ;;  %p34_p2 = scmp.ne.s32.totalorder %s751_s14, %s747_s13 }
  0x2a   : > { %p35_p4 = scmp.eq.s32.totalorder %s755_s15, 0  ;;  %p567_p6 = scmp.lt.s32.totalorder %s755_s15, 2 }
  0x2b   : > { %s879_s17 = scalar_select %p25_p1, %s751_s14, %s27_s25  }
  0x2c   : > { %p36_p8 = por %p35_p4, %p34_p2  ;;  %p1060_p10 = scmp.eq.s32.totalorder %s810_s16, 1 }
  0x2d   : > { %s148_s23 = sand.u32 1, %s751_s14   ;;  %s494_s27 = sshll.u32 %s755_s15, 8 }
  0x2e   : > { %p883_p12 = por %p1060_p10, %p34_p2  ;;  %s479_s28 = sshll.u32 %s148_s23, 4 }
  0x2f   : > { %s892_s4 = scalar_lea.hbm %s1049_s0, %s494_s27  ;;  %s152_s22 = scalar_lea.vmem [#allocation3], %s479_s28 }
  0x30   : > { %s159_s25 = sshll.u32 %s152_s22, 4  ;;  %p894_p11 = pnand %p567_p6, %p36_p8  ;;  %s898_s25 = int_to_ptr.vmem [resolvable:$true] %s159_s25 }
  0x31   : > { %s900_s5 = scalar_lea.sflag [#allocation4], %s148_s23  ;;  %s655_s6 = scalar_lea.hbm %s892_s4, 256 }
  0x32   : > { %p656_p13 = scmp.ne.s32.totalorder %s892_s4, %s655_s6  ;;  %p657_p0 = pneg %p894_p11 }
  0x33   : > { %s660_s11 = scalar_lea.hbm %s1049_s0, 512  ;;  %p661_p7 = scmp.lt.u32.totalorder %s892_s4, %s1049_s0 }
  0x34   : > { %p658_p3 = pnand %p657_p0, %p656_p13  ;;  %p662_p9 = scmp.lt.u32.totalorder %s660_s11, %s655_s6 }
  0x35   : > { %p664_p2 = scmp.lt.u32.totalorder %s655_s6, %s892_s4 }
  0x36   : > { %p659_p5 = pneg %p658_p3  ;;  %p663_p1 = por %p662_p9, %p661_p7 }
  0x38   : > { %p665_p4 = por %p664_p2, %p663_p1 }
  0x3a   : > { %p666_p6 = pnand %p665_p4, %p659_p5 }
  0x3c   : > { %669 = shalt.err (!%p666_p6)
}
  0x3d   : > { %s670_s23 = scalar_lea.vmem %s898_s25, 256  ;;  %s760_s29 = smov [#allocation3]  }
  0x3e   : > { %p671_p8 = scmp.ne.s32.totalorder %s898_s25, %s670_s23  ;;  %s675_s30 = sshll.u32 %s760_s29, 4  ;;  %s676_s30 = int_to_ptr.vmem [resolvable:$false] %s675_s30 }
  0x3f   : > { %s677_s22 = scalar_lea.vmem %s676_s30, 512  ;;  %p678_p3 = scmp.lt.s32.totalorder %s898_s25, %s676_s30 }
  0x40   : > { %p673_p10 = pnand %p671_p8, %p657_p0  ;;  %p679_p7 = scmp.lt.s32.totalorder %s677_s22, %s670_s23 }
  0x42   : > { %p674_p13 = pneg %p673_p10  ;;  %p680_p9 = por %p679_p7, %p678_p3 }
  0x44   : > { %p681_p1 = pnand %p680_p9, %p674_p13 }
  0x46   : > { %684 = shalt.err (!%p681_p1)
}
  0x47   : > { %561 = dma.hbm_to_vmem [thread:$0]  (!%p894_p11), %s892_s4, 256, %s898_s25, %s900_s5, %s758_s8, %s758_s8, %s759_s9  }
  0x48   : > { %p1063_p0 = scmp.ne.s32.totalorder %s1058_s20, 0 }
  0x49   : > { %s934_s6 = sand.u32 (!%p1063_p0), 1, %s747_s13   ;;  %p1064_p5 = scmp.ne.s32.totalorder (!%p1063_p0), %s1056_s18, 0 }
  0x4a   : > { %171 = sbr.rel (%p1063_p0) target bundleno = 453 (0x1c5), region = 32  ;;  %s483_s7 = sshll.u32 (!%p1063_p0), %s934_s6, 4 }
  0x4b   : > { %s174_s10 = scalar_lea.sflag (!%p1063_p0), [#allocation4], %s934_s6  ;;  %s177_s26 = scalar_lea.vmem (!%p1063_p0), [#allocation3], %s483_s7 }
  0x51   : > { %730 = dma.done.wait (%p1064_p5), %s174_s10, 256  }
  0x52   : > { %732 = vsyncadd (%p1064_p5), %s174_s10, 4294967040  ;;  %p1065_p11 = scmp.eq.s32.totalorder %s810_s16, 0 }
  0x54   : > { %734 = dma.done.wait (%p1065_p11), [#allocation7], 2560   ;;  %p1066_p2 = pmov %p1065_p11 }
  0x55   : > { %vm204_vm0 = vcmask 254976   ;;  %v761_v0 = vmov 0.0   ;;  %v762_v1 = vmov 0.0|0.0   ;;  %vm209_vm1 = vcmask 261120   ;;  %v207_v2 = vld [vmem:[%s177_s26] sm:$0xff]  ;;  %v208_v3 = vld [vmem:[%s177_s26 + $0x8] sm:$0xff] }
  0x56   : > { %736 = vsyncadd (%p1066_p2), [#allocation7], 4294964736  ;;  %205 = vst.msk [vmem:[#allocation2] sm:$0x3] %vm204_vm0, %v761_v0  ;;  %496 = vmatprep.subr.bf16.mxu0 %v762_v1  ;;  %526 = vmatprep.subr.bf16.mxu1 %v762_v1  ;;  %v275_v4 = vld [vmem:[#allocation6] sm:$0xff]  ;;  %v276_v5 = vld [vmem:[#allocation6 + $0x8] sm:$0xff] }
  0x57   : > { %206 = vst.msk [vmem:[#allocation2 + $0x12] sm:$0x3] %vm204_vm0, %v761_v0  ;;  %v277_v6 = vld [vmem:[#allocation6 + $0x10] sm:$0xff]  ;;  %v278_v7 = vld [vmem:[#allocation6 + $0x18] sm:$0xff]  ;;  %v497_v8 = vpack.c.bf16 %v276_v5, %v275_v4  ;;  %v279_v10 = vld [vmem:[#allocation6 + $0x20] sm:$0xff]  ;;  %vm218_vm2 = vcmask 1046528  }
  0x58   : > { %210 = vst.msk [vmem:[#allocation2 + $0x2] sm:$0xff] %vm209_vm1, %v207_v2  ;;  %211 = vst.msk [vmem:[#allocation2 + $0xa] sm:$0xff] %vm209_vm1, %v208_v3  ;;  %v500_v9 = vpack.c.bf16 %v278_v7, %v277_v6  ;;  %v280_v11 = vld [vmem:[#allocation6 + $0x28] sm:$0xff]  ;;  %v281_v12 = vld [vmem:[#allocation6 + $0x30] sm:$0xff]  ;;  %vm230_vm3 = vcmask 1045504   ;;  %vm242_vm4 = vcmask 1044480  }
  0x59   : > { %498 = vmatpush1.bf16.msra.mxu0 %v497_v8  ;;  %536 = vmatpush1.bf16.msra.mxu1 %v497_v8  ;;  %v282_v13 = vld [vmem:[#allocation6 + $0x38] sm:$0xff]  ;;  %v503_v17 = vpack.c.bf16 %v280_v11, %v279_v10  ;;  %v283_v36 = vld [vmem:[#allocation6 + $0x40] sm:$0xff]  ;;  %v284_v37 = vld [vmem:[#allocation6 + $0x48] sm:$0xff]  ;;  %vm254_vm5 = vcmask 1043456   ;;  %s763_s18 = smov 32   ;;  %s764_s20 = smov 96  }
  0x5a   : > { %499 = vmatprep.subr.bf16.mxu0 %v762_v1  ;;  %527 = vmatprep.subr.bf16.mxu1 %v762_v1  ;;  %v506_v18 = vpack.c.bf16 %v282_v13, %v281_v12  ;;  %v509_v42 = vpack.c.bf16 %v284_v37, %v283_v36  ;;  %v285_v45 = vld [vmem:[#allocation6 + $0x50] sm:$0xff]  ;;  %v286_v46 = vld [vmem:[#allocation6 + $0x58] sm:$0xff]  ;;  %s765_s8 = smov 64   ;;  %v287_v48 = vld [vmem:[#allocation6 + $0x60] sm:$0xff]  ;;  %vm262_vm6 = vcmask 523264   ;;  %vm265_vm7 = vcmask 785408  }
  0x5b   : > { %v512_v47 = vpack.c.bf16 %v286_v46, %v285_v45  ;;  %v288_v49 = vld [vmem:[#allocation6 + $0x68] sm:$0xff]  ;;  %v289_v51 = vld [vmem:[#allocation6 + $0x70] sm:$0xff]  ;;  %v290_v52 = vld [vmem:[#allocation6 + $0x78] sm:$0xff]  ;;  %s203_s9 = scalar_lea.vmem [#allocation8], %s483_s7  ;;  %s495_s25 = sshll.u32 %s810_s16, 8 }
  0x5c   : > { %v515_v50 = vpack.c.bf16 %v288_v49, %v287_v48  ;;  %v518_v53 = vpack.c.bf16 %v290_v52, %v289_v51  ;;  %v291_v54 = vld [vmem:[#allocation6 + $0x80] sm:$0xff]  ;;  %v292_v55 = vld [vmem:[#allocation6 + $0x88] sm:$0xff]  ;;  %v293_v57 = vld [vmem:[#allocation6 + $0x90] sm:$0xff]  ;;  %s392_s4 = sshll.u32 %s203_s9, 4  ;;  %s1005_s23 = scalar_lea.hbm %s1052_s3, %s495_s25  ;;  %s1000_s4 = int_to_ptr.vmem [resolvable:$true] %s392_s4 }
  0x5d   : > { %501 = vmatpush1.bf16.msra.mxu0 %v500_v9  ;;  %537 = vmatpush1.bf16.msra.mxu1 %v500_v9  ;;  %v521_v56 = vpack.c.bf16 %v292_v55, %v291_v54  ;;  %v294_v58 = vld [vmem:[#allocation6 + $0x98] sm:$0xff]  ;;  %v486_v11 = vld [vmem:[%s1051_s2] ss:$0 sm:$0xff]  ;;  %s379_s16 = scalar_lea.sflag [#allocation5], %s934_s6  ;;  %s685_s29 = scalar_lea.vmem %s1000_s4, 256 }
  0x5e   : > { %502 = vmatprep.subr.bf16.mxu0 %v762_v1  ;;  %528 = vmatprep.subr.bf16.mxu1 %v762_v1  ;;  %v524_v59 = vpack.c.bf16 %v294_v58, %v293_v57  ;;  %p686_p4 = scmp.ne.s32.totalorder %s1000_s4, %s685_s29  ;;  %s766_s30 = smov [#allocation8]  }
  0x5f   : > { %v954_v14 = vld [vmem:[#allocation2] sm:$0xff]  ;;  %v956_v15 = vld [vmem:[#allocation2 + $0x8] sm:$0xff]  ;;  %v214_v16 = vld [vmem:[#allocation2 + $0x10] sm:$0xf]  ;;  %s689_s22 = sshll.u32 %s766_s30, 4  ;;  %s690_s22 = int_to_ptr.vmem [resolvable:$false] %s689_s22 }
  0x60   : > { %v219_v19 = vrot.slane %v954_v14, 1  ;;  %v220_v20 = vrot.slane %v956_v15, 1  ;;  %v222_v21 = vrot.slane %v214_v16, 1  ;;  %v231_v22 = vrot.slane %v954_v14, 2  ;;  %p687_p6 = pnand %p686_p4, %p883_p12  ;;  %s691_s7 = scalar_lea.vmem %s690_s22, 512 }
  0x61   : > { %v232_v23 = vrot.slane %v956_v15, 2  ;;  %v234_v24 = vrot.slane %v214_v16, 2  ;;  %v243_v25 = vrot.slane %v954_v14, 3  ;;  %v244_v26 = vrot.slane %v956_v15, 3  ;;  %504 = vmatpush1.bf16.msra.mxu0 %v503_v17  ;;  %538 = vmatpush1.bf16.msra.mxu1 %v503_v17  ;;  %p692_p10 = scmp.lt.s32.totalorder %s1000_s4, %s690_s22  ;;  %p693_p13 = scmp.lt.s32.totalorder %s691_s7, %s685_s29 }
  0x62   : > { %v221_v27 = vsel %vm218_vm2, %v219_v19, %v220_v20  ;;  %v223_v28 = vsel %vm218_vm2, %v220_v20, %v222_v21  ;;  %v246_v29 = vrot.slane %v214_v16, 3  ;;  %v255_v30 = vrot.slane %v954_v14, 4  ;;  %505 = vmatprep.subr.bf16.mxu0 %v762_v1  ;;  %529 = vmatprep.subr.bf16.mxu1 %v762_v1  ;;  %p688_p8 = pneg %p687_p6 }
  0x63   : > { %v612_v31 = vpack.i.bf16 %v223_v28, %v221_v27  ;;  %v233_v32 = vsel %vm230_vm3, %v231_v22, %v232_v23  ;;  %v235_v33 = vsel %vm230_vm3, %v232_v23, %v234_v24  ;;  %v245_v34 = vsel %vm242_vm4, %v243_v25, %v244_v26  ;;  %p694_p3 = por %p693_p13, %p692_p10 }
  0x64   : > { %v247_v35 = vsel %vm242_vm4, %v244_v26, %v246_v29  ;;  %v256_v38 = vrot.slane %v956_v15, 4  ;;  %v258_v39 = vrot.slane %v214_v16, 4  ;;  %v617_v40 = vpack.i.bf16 %v235_v33, %v233_v32 }
  0x65   : > { %613 = vrot.lane.b32.xlu0 %v612_v31, %s763_s18  ;;  %v622_v41 = vpack.i.bf16 %v247_v35, %v245_v34  ;;  %507 = vmatpush1.bf16.msra.mxu0 %v506_v18  ;;  %p695_p7 = pnand %p694_p3, %p688_p8 }
  0x66   : > { %v257_v43 = vsel %vm254_vm5, %v255_v30, %v256_v38  ;;  %v259_v44 = vsel %vm254_vm5, %v256_v38, %v258_v39  ;;  %539 = vmatpush1.bf16.msra.mxu1 %v506_v18  ;;  %508 = vmatprep.subr.bf16.mxu0 %v762_v1 }
  0x67   : > { %623 = vrot.lane.b32.xlu1 %v622_v41, %s764_s20  ;;  %530 = vmatprep.subr.bf16.mxu1 %v762_v1 }
  0x68   : > { %487 = vmatprep.mubr.msk.f32.mxu0 %vm209_vm1, %v257_v43  ;;  %488 = vmatprep.mubr.msk.f32.mxu1 %vm209_vm1, %v259_v44 }
  0x69   : > { %618 = vrot.lane.b32.xlu0 %v617_v40, %s765_s8  ;;  %510 = vmatpush1.bf16.msra.mxu0 %v509_v42 }
  0x6a   : > { %540 = vmatpush1.bf16.msra.mxu1 %v509_v42  ;;  %511 = vmatprep.subr.bf16.mxu0 %v762_v1 }
  0x6b   : > { %531 = vmatprep.subr.bf16.mxu1 %v762_v1 }
  0x6d   : > { %513 = vmatpush1.bf16.msra.mxu0 %v512_v47 }
  0x6e   : > { %541 = vmatpush1.bf16.msra.mxu1 %v512_v47  ;;  %514 = vmatprep.subr.bf16.mxu0 %v762_v1 }
  0x6f   : > { %532 = vmatprep.subr.bf16.mxu1 %v762_v1 }
  0x71   : > { %516 = vmatpush1.bf16.msra.mxu0 %v515_v50 }
  0x72   : > { %542 = vmatpush1.bf16.msra.mxu1 %v515_v50  ;;  %517 = vmatprep.subr.bf16.mxu0 %v762_v1 }
  0x73   : > { %533 = vmatprep.subr.bf16.mxu1 %v762_v1 }
  0x75   : > { %519 = vmatpush1.bf16.msra.mxu0 %v518_v53 }
  0x76   : > { %543 = vmatpush1.bf16.msra.mxu1 %v518_v53  ;;  %520 = vmatprep.subr.bf16.mxu0 %v762_v1 }
  0x77   : > { %534 = vmatprep.subr.bf16.mxu1 %v762_v1 }
  0x79   : > { %522 = vmatpush1.bf16.msra.mxu0 %v521_v56 }
  0x7a   : > { %544 = vmatpush1.bf16.msra.mxu1 %v521_v56  ;;  %523 = vmatprep.subr.bf16.mxu0 %v762_v1 }
  0x7b   : > { %535 = vmatprep.subr.bf16.mxu1 %v762_v1 }
  0x7d   : > { %525 = vmatpush1.bf16.msra.mxu0 %v524_v59 }
  0x7e   : > { %545 = vmatpush1.bf16.msra.mxu1 %v524_v59 }
  0xd7   : > { %v614_v60 = vpop.permute.xlu0 %613 }
  0xd8   : > { %v616_v61 = vunpack.i.h.bf16 %v614_v60  ;;  %v615_v62 = vunpack.i.l.bf16 %v614_v60 }
  0xd9   : > { %v624_v63 = vpop.permute.xlu1 %623 }
  0xda   : > { %v626_v2 = vunpack.i.h.bf16 %v624_v63  ;;  %v625_v3 = vunpack.i.l.bf16 %v624_v63  ;;  %v260_v6 = vsel %vm209_vm1, %v954_v14, %v615_v62  ;;  %v261_v1 = vsel %vm209_vm1, %v956_v15, %v616_v61 }
  0xdb   : > { %v619_v0 = vpop.permute.xlu0 %618 }
  0xdc   : > { %v621_v4 = vunpack.i.h.bf16 %v619_v0  ;;  %v620_v5 = vunpack.i.l.bf16 %v619_v0 }
  0xde   : > { %v263_v7 = vsel %vm262_vm6, %v260_v6, %v620_v5  ;;  %v264_v8 = vsel %vm262_vm6, %v261_v1, %v621_v4 }
  0xdf   : > { %v266_v9 = vsel %vm265_vm7, %v263_v7, %v625_v3  ;;  %v267_v10 = vsel %vm265_vm7, %v264_v8, %v626_v2 }
  0xe0   : > { %364 = vmatmul.mubr.f32.vlgmr.msra.gmra.mrb[0].mxu0 %v266_v9  ;;  %369 = vmatmul.mubr.f32.vlgmr.msra.gmra.mrb[0].mxu1 %v267_v10 }
 0x1b3   : > { %v365_v12 = vpop.f32.mrb[0].mxu0  ;;  %v370_v13 = vpop.f32.mrb[0].mxu1 }
 0x1b4   : > { %v374_v14 = vadd.f32 %v486_v11, %v365_v12  ;;  %v375_v15 = vadd.f32 %v486_v11, %v370_v13  ;;  %v367_v16 = vpop.f32.mrb[1].mxu0  ;;  %v372_v17 = vpop.f32.mrb[1].mxu1 }
 0x1b6   : > { %376 = vst [vmem:[%s203_s9] sm:$0xff] %v374_v14  ;;  %377 = vst [vmem:[%s203_s9 + $0x8] sm:$0xff] %v375_v15 }
 0x1b7   : > { %698 = shalt.err (!%p695_p7)
}
 0x1b8   : > { %s699_s10 = scalar_lea.hbm %s1005_s23, 256  ;;  %s703_s20 = scalar_lea.hbm %s1052_s3, 512 }
 0x1b9   : > { %p700_p9 = scmp.ne.s32.totalorder %s1005_s23, %s699_s10  ;;  %p704_p5 = scmp.lt.u32.totalorder %s1005_s23, %s1052_s3 }
 0x1ba   : > { %p705_p11 = scmp.lt.u32.totalorder %s703_s20, %s699_s10  ;;  %p707_p4 = scmp.lt.u32.totalorder %s699_s10, %s1005_s23 }
 0x1bb   : > { %p701_p1 = pnand %p700_p9, %p883_p12 }
 0x1bc   : > { %p706_p2 = por %p705_p11, %p704_p5 }
 0x1bd   : > { %p702_p0 = pneg %p701_p1 }
 0x1be   : > { %p708_p6 = por %p707_p4, %p706_p2 }
 0x1c0   : > { %p709_p8 = pnand %p708_p6, %p702_p0 }
 0x1c2   : > { %712 = shalt.err (!%p709_p8)
}
 0x1c3   : > { %s767_s25 = smov 128   ;;  %s768_s5 = smov 8  }
 0x1c4   : > { %552 = dma.vmem_to_hbm [thread:$0]  (%p883_p12), %s1000_s4, 256, %s1005_s23, %s379_s16, %s767_s25, %s767_s25, %s768_s5  }
 0x1c5 PF: > { %s407_s11 = sand.u32 1, %s743_s12   ;;  %p1067_p10 = scmp.ne.s32.totalorder %s1057_s19, 0 }
 0x1c6   : > { %p1068_p13 = scmp.ge.s32.totalorder %s755_s15, 2  ;;  %s408_s27 = scalar_lea.sflag [#allocation5], %s407_s11 }
 0x1c8   : > { %p563_p3 = pnand %p1068_p13, %p1067_p10 }
 0x1ca   : > { %738 = dma.done.wait (!%p563_p3), %s408_s27, 256  }
 0x1cb   : > { %740 = vsyncadd (!%p563_p3), %s408_s27, 4294967040  ;;  %p17_p7 = scmp.ge.s32.totalorder %s845_s24, 4   ;;  %s1069_s12 = smov %s747_s13 }
 0x1cc   : > { %s1070_s13 = smov %s751_s14  ;;  %s1071_s14 = smov %s879_s17 }
 0x1cd   : > { %s1072_s15 = smov %s845_s24  ;;  %19 = sbr.rel (!%p17_p7) target bundleno = 6 (0x6), region = 81 }
 0x1d4   :  { %413 = vsyncpa [#allocation4], 1 }
 0x1d5   :  { %415 = vsyncpa [#allocation4 + $0x1], 1 }
 0x1d6   :  { %416 = vsyncpa [#allocation7], 1 }
 0x1d7   :  { %417 = vsyncpa [#allocation5], 1 }
 0x1d8   :  { %419 = vsyncpa [#allocation5 + $0x1], 1 }

</bundles_post_ra>
